<compile_context>
chip_gen: v7x
topology: tpu7x:2x2x1
jax: 0.10.0
libtpu: 0.0.40
codegen_flags: <defaults>
</compile_context>

<pallas_src>
import functools

import jax
import jax.numpy as jnp
from jax.experimental import pallas as pl
from jax.experimental.pallas import tpu as pltpu


def _round_up(n, m):
    return ((n + m - 1) // m) * m


def _cdiv(a, b):
    return (a + b - 1) // b


def _qnet_kernel(x_ref, w1_ref, b1_ref, w2_ref, b2_ref, w3_ref, b3_ref, out_ref):
    """Fused 3-layer MLP tile: relu(relu(relu(x@W1+b1)@W2+b2)@W3+b3)."""
    x = x_ref[...]  # bf16 activations

    h1 = jnp.dot(x, w1_ref[...], preferred_element_type=jnp.float32) + b1_ref[...]
    h1 = jnp.maximum(h1, 0.0).astype(jnp.bfloat16)

    h2 = jnp.dot(h1, w2_ref[...], preferred_element_type=jnp.float32) + b2_ref[...]
    h2 = jnp.maximum(h2, 0.0).astype(jnp.bfloat16)

    h3 = jnp.dot(h2, w3_ref[...], preferred_element_type=jnp.float32) + b3_ref[...]
    out_ref[...] = jnp.maximum(h3, 0.0)


def prepare_params(params):
    """One-time param prep (hoisted out of the forward path): bf16 weights for
    the MXU, f32 (1, out)-shaped biases for broadcast."""
    w1, b1, w2, b2, w3, b3 = params
    return (
        w1.astype(jnp.bfloat16), b1.astype(jnp.float32),
        w2.astype(jnp.bfloat16), b2.astype(jnp.float32),
        w3.astype(jnp.bfloat16), b3.astype(jnp.float32),
    )


def qnetwork_forward(x, prepared_params, *, max_tile_batch=2048):
    """x: [batch, state_size] f32 -> [batch, action_size] f32."""
    w1, b1, w2, b2, w3, b3 = prepared_params
    batch, state_size = x.shape
    fc1 = w1.shape[1]
    fc2 = w2.shape[1]
    action_size = w3.shape[1]

    # Halve the input HBM read: activations move as bf16, accumulate in f32.
    xb = x.astype(jnp.bfloat16)

    # Batch tile: whole batch when small (block == full array dim is always
    # legal); otherwise >= 2 tiles so both v7x TensorCores get work, 16-row
    # aligned (bf16 sublane tiling), capped far below the VMEM budget.
    if batch <= 16:
        tb = batch
    else:
        tb = min(max_tile_batch, _round_up(_cdiv(batch, 2), 16))
    grid = (_cdiv(batch, tb),)

    flops = 2 * batch * (state_size * fc1 + fc1 * fc2 + fc2 * action_size)
    bytes_accessed = (
        batch * state_size * 2                                       # bf16 in
        + batch * action_size * 4                                    # f32 out
        + (state_size * fc1 + fc1 * fc2 + fc2 * action_size) * 2     # bf16 W
        + (fc1 + fc2 + action_size) * 4                              # f32 b
    )

    const = lambda i: (0, 0)  # weights/biases stay resident across batch tiles
    out = pl.pallas_call(
        _qnet_kernel,
        out_shape=jax.ShapeDtypeStruct((batch, action_size), jnp.float32),
        grid=grid,
        in_specs=[
            pl.BlockSpec((tb, state_size), lambda i: (i, 0)),
            pl.BlockSpec(w1.shape, const),
            pl.BlockSpec(b1.shape, const),
            pl.BlockSpec(w2.shape, const),
            pl.BlockSpec(b2.shape, const),
            pl.BlockSpec(w3.shape, const),
            pl.BlockSpec(b3.shape, const),
        ],
        out_specs=pl.BlockSpec((tb, action_size), lambda i: (i, 0)),
        compiler_params=pltpu.CompilerParams(dimension_semantics=("parallel",)),
        cost_estimate=pl.CostEstimate(
            flops=flops, transcendentals=0, bytes_accessed=bytes_accessed
        ),
    )(xb, w1, b1, w2, b2, w3, b3)

    return out


def init_params(key, state_size, action_size, fc1_units=64, fc2_units=32):
    """Mirror the PyTorch module: xavier_normal_ weights, PyTorch-default
    uniform(-1/sqrt(fan_in), 1/sqrt(fan_in)) biases. Weights stored [in, out]."""
    ks = jax.random.split(key, 6)

    def xavier_normal(k, fan_in, fan_out):
        std = (2.0 / (fan_in + fan_out)) ** 0.5
        return std * jax.random.normal(k, (fan_in, fan_out), dtype=jnp.float32)

    def bias_uniform(k, fan_in, fan_out):
        bound = 1.0 / (fan_in ** 0.5)
        return jax.random.uniform(
            k, (1, fan_out), dtype=jnp.float32, minval=-bound, maxval=bound
        )

    w1 = xavier_normal(ks[0], state_size, fc1_units)
    b1 = bias_uniform(ks[1], state_size, fc1_units)
    w2 = xavier_normal(ks[2], fc1_units, fc2_units)
    b2 = bias_uniform(ks[3], fc1_units, fc2_units)
    w3 = xavier_normal(ks[4], fc2_units, action_size)
    b3 = bias_uniform(ks[5], fc2_units, action_size)
    return (w1, b1, w2, b2, w3, b3)


def reference_forward(x, params):
    """Pure-JAX reference mirroring the kernel's bf16-input / f32-accum math."""
    w1, b1, w2, b2, w3, b3 = params

    def lin_relu(a, w, b):
        y = jnp.dot(
            a.astype(jnp.bfloat16),
            w.astype(jnp.bfloat16),
            preferred_element_type=jnp.float32,
        ) + b
        return jnp.maximum(y, 0.0)

    h = lin_relu(x, w1, b1)
    h = lin_relu(h, w2, b2)
    return lin_relu(h, w3, b3)


if __name__ == "__main__":
    state_size = 8
    action_size = 4

    key = jax.random.PRNGKey(0)
    k_x, k_x2, k_p = jax.random.split(key, 3)

    params = init_params(k_p, state_size, action_size, fc1_units=64, fc2_units=32)
    prep = prepare_params(params)  # one-time weight prep, outside the hot path

    fwd = jax.jit(qnetwork_forward)

    # Small spec-sized case: batch=2 (single tile, block == full array dims).
    batch = 2
    x = jax.random.normal(k_x, (batch, state_size), dtype=jnp.float32)
    out = jax.block_until_ready(fwd(x, prep))
    ref = reference_forward(x, params)
    assert out.shape == (batch, action_size)
    assert jnp.allclose(out, ref, atol=2e-2, rtol=2e-2), (out, ref)

    # Larger ragged case: batch=100 -> tb=64, grid=(2,), partial last block.
    batch2 = 100
    x2 = jax.random.normal(k_x2, (batch2, state_size), dtype=jnp.float32)
    out2 = jax.block_until_ready(fwd(x2, prep))
    ref2 = reference_forward(x2, params)
    assert out2.shape == (batch2, action_size)
    assert jnp.allclose(out2, ref2, atol=2e-2, rtol=2e-2)

    print("KERNEL_OK")
</pallas_src>

<mosaic_0001>
module attributes {stable_mosaic.version = 11 : i64} {
  func.func @_qnet_kernel(%arg0: i32, %arg1: memref<2x8xbf16, #tpu.memory_space<vmem>>, %arg2: memref<8x64xbf16, #tpu.memory_space<vmem>>, %arg3: memref<1x64xf32, #tpu.memory_space<vmem>>, %arg4: memref<64x32xbf16, #tpu.memory_space<vmem>>, %arg5: memref<1x32xf32, #tpu.memory_space<vmem>>, %arg6: memref<32x4xbf16, #tpu.memory_space<vmem>>, %arg7: memref<1x4xf32, #tpu.memory_space<vmem>>, %arg8: memref<2x4xf32, #tpu.memory_space<vmem>>) attributes {dimension_semantics = [#tpu.dimension_semantics<parallel>], iteration_bounds = array<i64: 1>, scalar_prefetch = 0 : i64, scratch_operands = 0 : i64, tpu.core_type = #tpu.core_type<tc>, window_params = [{transform_indices = @transform_0, window_bounds = array<i64: 2, 8>}, {pipeline_mode = #tpu.pipeline_mode<synchronous>, transform_indices = @transform_1, window_bounds = array<i64: 8, 64>}, {pipeline_mode = #tpu.pipeline_mode<synchronous>, transform_indices = @transform_2, window_bounds = array<i64: 1, 64>}, {pipeline_mode = #tpu.pipeline_mode<synchronous>, transform_indices = @transform_3, window_bounds = array<i64: 64, 32>}, {pipeline_mode = #tpu.pipeline_mode<synchronous>, transform_indices = @transform_4, window_bounds = array<i64: 1, 32>}, {pipeline_mode = #tpu.pipeline_mode<synchronous>, transform_indices = @transform_5, window_bounds = array<i64: 32, 4>}, {pipeline_mode = #tpu.pipeline_mode<synchronous>, transform_indices = @transform_6, window_bounds = array<i64: 1, 4>}, {transform_indices = @transform_7, window_bounds = array<i64: 2, 4>}]} {
    %c0 = arith.constant 0 : index
    %c0_0 = arith.constant 0 : index
    %0 = vector.load %arg1[%c0, %c0_0] : memref<2x8xbf16, #tpu.memory_space<vmem>>, vector<2x8xbf16>
    %c0_1 = arith.constant 0 : index
    %c0_2 = arith.constant 0 : index
    %1 = vector.load %arg2[%c0_1, %c0_2] : memref<8x64xbf16, #tpu.memory_space<vmem>>, vector<8x64xbf16>
    %cst = arith.constant dense<0.000000e+00> : vector<2x64xf32>
    %2 = tpu.matmul %0, %1, %cst {dimension_numbers = #tpu.dot_dimension_numbers<[1], [0], [0], [1], [0, 0, 1, 1], [], []>} : vector<2x8xbf16>, vector<8x64xbf16>, vector<2x64xf32> -> vector<2x64xf32>
    %c0_3 = arith.constant 0 : index
    %c0_4 = arith.constant 0 : index
    %3 = vector.load %arg3[%c0_3, %c0_4] : memref<1x64xf32, #tpu.memory_space<vmem>>, vector<1x64xf32>
    %4 = vector.broadcast %3 : vector<1x64xf32> to vector<2x64xf32>
    %5 = arith.addf %2, %4 : vector<2x64xf32>
    %cst_5 = arith.constant 0.000000e+00 : f32
    %6 = vector.broadcast %cst_5 : f32 to vector<2x64xf32>
    %7 = arith.maximumf %5, %6 : vector<2x64xf32>
    %8 = arith.truncf %7 : vector<2x64xf32> to vector<2x64xbf16>
    %c0_6 = arith.constant 0 : index
    %c0_7 = arith.constant 0 : index
    %9 = vector.load %arg4[%c0_6, %c0_7] : memref<64x32xbf16, #tpu.memory_space<vmem>>, vector<64x32xbf16>
    %cst_8 = arith.constant dense<0.000000e+00> : vector<2x32xf32>
    %10 = tpu.matmul %8, %9, %cst_8 {dimension_numbers = #tpu.dot_dimension_numbers<[1], [0], [0], [1], [0, 0, 1, 1], [], []>} : vector<2x64xbf16>, vector<64x32xbf16>, vector<2x32xf32> -> vector<2x32xf32>
    %c0_9 = arith.constant 0 : index
    %c0_10 = arith.constant 0 : index
    %11 = vector.load %arg5[%c0_9, %c0_10] : memref<1x32xf32, #tpu.memory_space<vmem>>, vector<1x32xf32>
    %12 = vector.broadcast %11 : vector<1x32xf32> to vector<2x32xf32>
    %13 = arith.addf %10, %12 : vector<2x32xf32>
    %cst_11 = arith.constant 0.000000e+00 : f32
    %14 = vector.broadcast %cst_11 : f32 to vector<2x32xf32>
    %15 = arith.maximumf %13, %14 : vector<2x32xf32>
    %16 = arith.truncf %15 : vector<2x32xf32> to vector<2x32xbf16>
    %c0_12 = arith.constant 0 : index
    %c0_13 = arith.constant 0 : index
    %17 = vector.load %arg6[%c0_12, %c0_13] : memref<32x4xbf16, #tpu.memory_space<vmem>>, vector<32x4xbf16>
    %cst_14 = arith.constant dense<0.000000e+00> : vector<2x4xf32>
    %18 = tpu.matmul %16, %17, %cst_14 {dimension_numbers = #tpu.dot_dimension_numbers<[1], [0], [0], [1], [0, 0, 1, 1], [], []>} : vector<2x32xbf16>, vector<32x4xbf16>, vector<2x4xf32> -> vector<2x4xf32>
    %c0_15 = arith.constant 0 : index
    %c0_16 = arith.constant 0 : index
    %19 = vector.load %arg7[%c0_15, %c0_16] : memref<1x4xf32, #tpu.memory_space<vmem>>, vector<1x4xf32>
    %20 = vector.broadcast %19 : vector<1x4xf32> to vector<2x4xf32>
    %21 = arith.addf %18, %20 : vector<2x4xf32>
    %cst_17 = arith.constant 0.000000e+00 : f32
    %22 = vector.broadcast %cst_17 : f32 to vector<2x4xf32>
    %23 = arith.maximumf %21, %22 : vector<2x4xf32>
    %c0_18 = arith.constant 0 : index
    %c0_19 = arith.constant 0 : index
    %24 = vector.load %arg8[%c0_18, %c0_19] : memref<2x4xf32, #tpu.memory_space<vmem>>, vector<2x4xf32>
    tpu.vector_store %arg8[%c0_18, %c0_19], %23 {strides = array<i32>} : memref<2x4xf32, #tpu.memory_space<vmem>>, vector<2x4xf32>,
    return
  }
  func.func @transform_0(%arg0: i32) -> (i32, i32) {
    %c0_i32 = arith.constant 0 : i32
    %c0_i32_0 = arith.constant 0 : i32
    return %arg0, %c0_i32 : i32, i32
  }
  func.func @transform_1(%arg0: i32) -> (i32, i32) {
    %c0_i32 = arith.constant 0 : i32
    %c0_i32_0 = arith.constant 0 : i32
    %c0_i32_1 = arith.constant 0 : i32
    return %c0_i32, %c0_i32_0 : i32, i32
  }
  func.func @transform_2(%arg0: i32) -> (i32, i32) {
    %c0_i32 = arith.constant 0 : i32
    %c0_i32_0 = arith.constant 0 : i32
    %c0_i32_1 = arith.constant 0 : i32
    return %c0_i32, %c0_i32_0 : i32, i32
  }
  func.func @transform_3(%arg0: i32) -> (i32, i32) {
    %c0_i32 = arith.constant 0 : i32
    %c0_i32_0 = arith.constant 0 : i32
    %c0_i32_1 = arith.constant 0 : i32
    return %c0_i32, %c0_i32_0 : i32, i32
  }
  func.func @transform_4(%arg0: i32) -> (i32, i32) {
    %c0_i32 = arith.constant 0 : i32
    %c0_i32_0 = arith.constant 0 : i32
    %c0_i32_1 = arith.constant 0 : i32
    return %c0_i32, %c0_i32_0 : i32, i32
  }
  func.func @transform_5(%arg0: i32) -> (i32, i32) {
    %c0_i32 = arith.constant 0 : i32
    %c0_i32_0 = arith.constant 0 : i32
    %c0_i32_1 = arith.constant 0 : i32
    return %c0_i32, %c0_i32_0 : i32, i32
  }
  func.func @transform_6(%arg0: i32) -> (i32, i32) {
    %c0_i32 = arith.constant 0 : i32
    %c0_i32_0 = arith.constant 0 : i32
    %c0_i32_1 = arith.constant 0 : i32
    return %c0_i32, %c0_i32_0 : i32, i32
  }
  func.func @transform_7(%arg0: i32) -> (i32, i32) {
    %c0_i32 = arith.constant 0 : i32
    %c0_i32_0 = arith.constant 0 : i32
    return %arg0, %c0_i32 : i32, i32
  }
}

</mosaic_0001>

<bundles_post_ra>
// kernel: qnetwork_forward.1
= control target key start
LH: loop header
LB: loop body
LE: loop exit
PB: predicated region body
PF: predicated region fallthrough
CT: control target
= control target key end

     0   :  { %vm41_vm0 = vcmask 1043456   ;;  %vm37_vm1 = vcmask 64512   ;;  %v337_v1 = vmov 0.0   ;;  %vm338_vm2 = vmmov 0   ;;  %s425_s0 = inlined_call_operand.vmem [shape: bf16[2,8], index: 0, kind: input, shape index: {}]   ;;  %s426_s1 = inlined_call_operand.vmem [shape: bf16[8,64], index: 1, kind: input, shape index: {}]   ;;  %s427_s2 = inlined_call_operand.vmem [shape: f32[1,64], index: 2, kind: input, shape index: {}]   ;;  %s428_s3 = inlined_call_operand.vmem [shape: bf16[64,32], index: 3, kind: input, shape index: {}]   ;;  %s429_s4 = inlined_call_operand.vmem [shape: f32[1,32], index: 4, kind: input, shape index: {}]   ;;  %s430_s5 = inlined_call_operand.vmem [shape: bf16[32,4], index: 5, kind: input, shape index: {}]   ;;  %s431_s6 = inlined_call_operand.vmem [shape: f32[1,4], index: 6, kind: input, shape index: {}]   ;;  %s432_s7 = inlined_call_operand.hbm [shape: f32[2,4], index: 7, kind: output, shape index: {}]  }
   0x1   :  { %v29_v0 = vld [vmem:[%s426_s1] sm:$0xf]  ;;  %278 = vmatprep.subr.bf16.mxu0 %v337_v1  ;;  %280 = vmatprep.mubr.msk.bf16.mxu0 %vm338_vm2, %v337_v1  ;;  %v308_v5 = vld [vmem:[%s428_s3 + $0x8] sm:$0xff]  }
   0x2   :  { %v43_v2 = vsel %vm41_vm0, %v29_v0, 0  ;;  %v28_v3 = vld [vmem:[%s425_s0] sm:$0x1]  ;;  %284 = vmatprep.subr.bf16.mxu1 %v337_v1  ;;  %292 = vmatprep.mubr.msk.bf16.mxu1 %vm338_vm2, %v337_v1 }
   0x3   :  { %v307_v4 = vld [vmem:[%s428_s3] sm:$0xff]   ;;  %279 = vmatpush3.bf16.msra.mxu0 %v43_v2 }
   0x4   :  { %285 = vmatpush3.bf16.msra.mxu1 %v307_v4  ;;  %296 = vmatprep.subr.bf16.mxu0 %v337_v1 }
   0x5   :  { %286 = vmatprep.subr.bf16.mxu1 %v337_v1 }
   0x6   :  { %281 = vmatmul.mubr.msk.bf16.vlgmr.msra.gmra.mrb[0].mxu0 %vm37_vm1, %v28_v3 }
   0x7   :  { %300 = vmatprep.mubr.msk.bf16.mxu0 %vm338_vm2, %v337_v1 }
   0x8   :  { %12 = vsyncpa [#allocation3], 0  ;;  %287 = vmatpush3.bf16.msra.mxu1 %v308_v5  ;;  %v309_v6 = vld [vmem:[%s428_s3 + $0x10] sm:$0xff]   ;;  %v310_v7 = vld [vmem:[%s428_s3 + $0x18] sm:$0xff]   ;;  %vm126_vm3 = vcmask 523264   ;;  %vm195_vm4 = vcmask 261120  }
   0x9   :  { %288 = vmatprep.subr.bf16.mxu1 %v337_v1  ;;  %v311_v8 = vld [vmem:[%s430_s5] sm:$0xff]   ;;  %v312_v17 = vld [vmem:[%s430_s5 + $0x8] sm:$0xff]   ;;  %s339_s5 = smov [#allocation2]   ;;  %vm240_vm5 = vcmask 25600  }
   0xa   :  { %297 = vmatpush3.bf16.msra.mxu0 %v311_v8  ;;  %v256_v9 = vld [vmem:[%s427_s2] ss:$0 sm:$0xff]  ;;  %s248_s19 = sshll.u32 %s339_s5, 4  ;;  %s249_s19 = int_to_ptr.vmem [resolvable:$true] %s248_s19 }
   0xb   :  { %298 = vmatprep.subr.bf16.mxu0 %v337_v1  ;;  %v258_v18 = vld [vmem:[%s429_s4] ss:$0 sm:$0xff]  ;;  %s313_s4 = scalar_lea.vmem %s249_s19, 32  ;;  %p318_p1 = scmp.lt.s32.totalorder %s249_s19, %s249_s19 }
   0xc   :  { %289 = vmatpush3.bf16.msra.mxu1 %v309_v6  ;;  %v264_v26 = vld [vmem:[%s431_s6] ss:$0 sm:$0xff]  ;;  %p314_p0 = scmp.ne.s32.totalorder %s249_s19, %s313_s4  ;;  %p319_p2 = scmp.lt.s32.totalorder %s313_s4, %s313_s4 }
   0xd   :  { %290 = vmatprep.subr.bf16.mxu1 %v337_v1 }
   0xe   :  { %299 = vmatpush3.bf16.msra.mxu0 %v312_v17  ;;  %p320_p3 = por %p319_p2, %p318_p1 }
  0x10   :  { %291 = vmatpush3.bf16.msra.mxu1 %v310_v7  ;;  %p321_p4 = pnand %p320_p3, %p314_p0 }
  0xd9   :  { %v79_v10 = vpop.f32.mrb[0].mxu0 }
  0xda   :  { %v80_v11 = vadd.f32 %v256_v9, %v79_v10  ;;  %v282_v12 = vpop.f32.mrb[1].mxu0 }
  0xdb   :  { %v82_v13 = vpop.f32.mrb[2].mxu0 }
  0xdc   :  { %v85_v14 = vmax.f32 %v80_v11, 0.0  ;;  %v283_v15 = vpop.f32.mrb[3].mxu0 }
  0xde   :  { %v86_v16 = vpack.c.bf16 %v85_v14, %v85_v14 }
  0xe0   :  { %293 = vmatmul.mubr.msk.bf16.vlgmr.msra.gmra.mrb[0].mxu1 %vm126_vm3, %v86_v16 }
 0x1b3   :  { %v164_v19 = vpop.f32.mrb[0].mxu1 }
 0x1b4   :  { %v165_v20 = vadd.f32 %v258_v18, %v164_v19  ;;  %v294_v21 = vpop.f32.mrb[1].mxu1 }
 0x1b5   :  { %v167_v22 = vpop.f32.mrb[2].mxu1 }
 0x1b6   :  { %v170_v23 = vmax.f32 %v165_v20, 0.0  ;;  %v295_v24 = vpop.f32.mrb[3].mxu1 }
 0x1b8   :  { %v171_v25 = vpack.c.bf16 %v170_v23, %v170_v23 }
 0x1ba   :  { %301 = vmatmul.mubr.msk.bf16.vlgmr.msra.gmra.mrb[4].mxu0 %vm195_vm4, %v171_v25 }
 0x28d   :  { %v233_v27 = vpop.f32.mrb[4].mxu0 }
 0x28e   :  { %v234_v28 = vadd.f32 %v264_v26, %v233_v27  ;;  %v302_v29 = vpop.f32.mrb[5].mxu0 }
 0x28f   :  { %v236_v30 = vpop.f32.mrb[6].mxu0 }
 0x290   :  { %v239_v31 = vmax.f32 %v234_v28, 0.0  ;;  %v303_v32 = vpop.f32.mrb[7].mxu0 }
 0x292   :  { %241 = vst.msk [vmem:[#allocation2] sm:$0x3] %vm240_vm5, %v239_v31 }
 0x293   :  { %324 = shalt.err (!%p321_p4)
}
 0x294   :  { %s325_s21 = scalar_lea.hbm %s432_s7, 32 }
 0x295   :  { %p326_p5 = scmp.ne.s32.totalorder %s432_s7, %s325_s21  ;;  %p329_p6 = scmp.lt.u32.totalorder %s325_s21, %s432_s7 }
 0x297   :  { %p331_p7 = pnand %p329_p6, %p326_p5 }
 0x299   :  { %334 = shalt.err (!%p331_p7)
}
 0x29a   :  { %251 = dma.vmem_to_hbm [thread:$0]  %s249_s19, 32, %s432_s7, [#allocation3]  }
 0x29b   :  { %335 = dma.done.wait [#allocation3], 32  }
 0x29c   :  { %336 = vsyncadd [#allocation3], 4294967264 }
 0x29d   :  { %255 = vsyncpa [#allocation3], 1 }

</bundles_post_ra>
